<compile_context>
chip_gen: v6e
topology: v6e:2x2x1
jax: 0.10.0
libtpu: 0.0.40
codegen_flags: <defaults>
</compile_context>

<pallas_src>
import jax
import jax.numpy as jnp
from jax.experimental import pallas as pl
from jax.experimental.pallas import tpu as pltpu

MAX_TILE_B = 512  # sweep 256-1024 for very large batches; multiple of 8 (f32 sublane)


def mlp_kernel(x_ref, w1_ref, b1_ref, w2_ref, b2_ref, w3_ref, b3_ref, o_ref):
    """Fused 3-layer MLP forward on one (tile_b, in_features) activation tile."""
    x = x_ref[...]  # f32; MXU consumes directly

    # fc1 + ReLU   (dropout == identity in eval mode)
    h1 = jnp.dot(x, w1_ref[...], preferred_element_type=jnp.float32) + b1_ref[...]
    h1 = jnp.maximum(h1, 0.0)

    # fc2 + ReLU   (dropout == identity in eval mode)
    h2 = jnp.dot(h1, w2_ref[...], preferred_element_type=jnp.float32) + b2_ref[...]
    h2 = jnp.maximum(h2, 0.0)

    # fc3 (logits, no activation)
    o_ref[...] = (
        jnp.dot(h2, w3_ref[...], preferred_element_type=jnp.float32) + b3_ref[...]
    ).astype(o_ref.dtype)


def _round_up(v, m):
    return ((v + m - 1) // m) * m


def _choose_tile_b(batch, max_tile=MAX_TILE_B):
    """Batch tile: big (amortize per-step overhead, fill MXU rows) but keep
    >=2 grid steps when possible so v7x can shard tiles across its 2 TCs."""
    if batch <= 8:
        return 8
    half = _round_up((batch + 1) // 2, 8)  # ~half the batch, sublane-aligned
    return max(8, min(max_tile, half))


def simple_test_model_forward(x, params, *, tile_b=None):
    """Batch-tiled pallas_call; weights pinned in VMEM, activations streamed."""
    w1, b1, w2, b2, w3, b3 = params
    batch, in_features = x.shape
    hidden = w1.shape[1]
    num_classes = w3.shape[1]

    if tile_b is None:
        tile_b = _choose_tile_b(batch)

    grid = (pl.cdiv(batch, tile_b),)

    # Constant index_map -> weight/bias blocks stay resident in VMEM.
    resident = lambda shape: pl.BlockSpec(shape, lambda i: (0, 0))

    return pl.pallas_call(
        mlp_kernel,
        out_shape=jax.ShapeDtypeStruct((batch, num_classes), jnp.float32),
        grid=grid,
        in_specs=[
            pl.BlockSpec((tile_b, in_features), lambda i: (i, 0)),  # stream x
            resident((in_features, hidden)),
            resident((1, hidden)),
            resident((hidden, hidden)),
            resident((1, hidden)),
            resident((hidden, num_classes)),
            resident((1, num_classes)),
        ],
        out_specs=pl.BlockSpec((tile_b, num_classes), lambda i: (i, 0)),
        compiler_params=pltpu.CompilerParams(
            dimension_semantics=("parallel",)  # shards batch tiles across TCs on v7x
        ),
    )(x, w1, b1, w2, b2, w3, b3)


def init_params(key, input_size=10, hidden_size=32, num_classes=3):
    """nn.Linear-style init: U(-1/sqrt(fan_in), 1/sqrt(fan_in)).

    Weights are stored transposed vs. PyTorch, i.e. (in, out), so each layer is
    y = x @ W + b; biases are (1, out) for clean broadcast over the batch dim.
    """
    def linear(k, fan_in, fan_out):
        kw, kb = jax.random.split(k)
        bound = 1.0 / jnp.sqrt(float(fan_in))
        w = jax.random.uniform(kw, (fan_in, fan_out), jnp.float32, -bound, bound)
        b = jax.random.uniform(kb, (1, fan_out), jnp.float32, -bound, bound)
        return w, b

    k1, k2, k3 = jax.random.split(key, 3)
    w1, b1 = linear(k1, input_size, hidden_size)
    w2, b2 = linear(k2, hidden_size, hidden_size)
    w3, b3 = linear(k3, hidden_size, num_classes)
    return (w1, b1, w2, b2, w3, b3)


def reference_forward(x, params):
    """Pure-JAX reference (eval-mode dropout == identity)."""
    w1, b1, w2, b2, w3, b3 = params
    h1 = jnp.maximum(x @ w1 + b1, 0.0)
    h2 = jnp.maximum(h1 @ w2 + b2, 0.0)
    return h2 @ w3 + b3


if __name__ == "__main__":
    key = jax.random.PRNGKey(0)
    k_params, k_x1, k_x2 = jax.random.split(key, 3)

    input_size, hidden_size, num_classes = 10, 32, 3
    params = init_params(k_params, input_size, hidden_size, num_classes)

    # Small batch (single grid step, tile_b == 8).
    x_small = jax.random.normal(k_x1, (8, input_size), jnp.float32)
    out_small = jax.block_until_ready(simple_test_model_forward(x_small, params))
    ref_small = reference_forward(x_small, params)
    assert out_small.shape == (8, num_classes), out_small.shape
    assert jnp.allclose(out_small, ref_small, atol=1e-5, rtol=1e-5), "small-batch mismatch"

    # Larger, non-multiple-of-tile batch: exercises the 2-step parallel grid and
    # the clipped partial last block (no jnp.pad anywhere on the hot path).
    x_big = jax.random.normal(k_x2, (67, input_size), jnp.float32)
    out_big = jax.block_until_ready(simple_test_model_forward(x_big, params))
    ref_big = reference_forward(x_big, params)
    assert out_big.shape == (67, num_classes), out_big.shape
    assert jnp.allclose(out_big, ref_big, atol=1e-5, rtol=1e-5), "big-batch mismatch"

    print("KERNEL_OK")
</pallas_src>

<mosaic_0001>
module attributes {stable_mosaic.version = 11 : i64} {
  func.func @mlp_kernel(%arg0: i32, %arg1: memref<8x10xf32, #tpu.memory_space<vmem>>, %arg2: memref<10x32xf32, #tpu.memory_space<vmem>>, %arg3: memref<1x32xf32, #tpu.memory_space<vmem>>, %arg4: memref<32x32xf32, #tpu.memory_space<vmem>>, %arg5: memref<1x32xf32, #tpu.memory_space<vmem>>, %arg6: memref<32x3xf32, #tpu.memory_space<vmem>>, %arg7: memref<1x3xf32, #tpu.memory_space<vmem>>, %arg8: memref<8x3xf32, #tpu.memory_space<vmem>>) attributes {dimension_semantics = [#tpu.dimension_semantics<parallel>], iteration_bounds = array<i64: 1>, scalar_prefetch = 0 : i64, scratch_operands = 0 : i64, tpu.core_type = #tpu.core_type<tc>, window_params = [{transform_indices = @transform_0, window_bounds = array<i64: 8, 10>}, {pipeline_mode = #tpu.pipeline_mode<synchronous>, transform_indices = @transform_1, window_bounds = array<i64: 10, 32>}, {pipeline_mode = #tpu.pipeline_mode<synchronous>, transform_indices = @transform_2, window_bounds = array<i64: 1, 32>}, {pipeline_mode = #tpu.pipeline_mode<synchronous>, transform_indices = @transform_3, window_bounds = array<i64: 32, 32>}, {pipeline_mode = #tpu.pipeline_mode<synchronous>, transform_indices = @transform_4, window_bounds = array<i64: 1, 32>}, {pipeline_mode = #tpu.pipeline_mode<synchronous>, transform_indices = @transform_5, window_bounds = array<i64: 32, 3>}, {pipeline_mode = #tpu.pipeline_mode<synchronous>, transform_indices = @transform_6, window_bounds = array<i64: 1, 3>}, {transform_indices = @transform_7, window_bounds = array<i64: 8, 3>}]} {
    %c0 = arith.constant 0 : index
    %c0_0 = arith.constant 0 : index
    %0 = vector.load %arg1[%c0, %c0_0] : memref<8x10xf32, #tpu.memory_space<vmem>>, vector<8x10xf32>
    %c0_1 = arith.constant 0 : index
    %c0_2 = arith.constant 0 : index
    %1 = vector.load %arg2[%c0_1, %c0_2] : memref<10x32xf32, #tpu.memory_space<vmem>>, vector<10x32xf32>
    %cst = arith.constant dense<0.000000e+00> : vector<8x32xf32>
    %2 = tpu.matmul %0, %1, %cst {dimension_numbers = #tpu.dot_dimension_numbers<[1], [0], [0], [1], [0, 0, 1, 1], [], []>} : vector<8x10xf32>, vector<10x32xf32>, vector<8x32xf32> -> vector<8x32xf32>
    %c0_3 = arith.constant 0 : index
    %c0_4 = arith.constant 0 : index
    %3 = vector.load %arg3[%c0_3, %c0_4] : memref<1x32xf32, #tpu.memory_space<vmem>>, vector<1x32xf32>
    %4 = vector.broadcast %3 : vector<1x32xf32> to vector<8x32xf32>
    %5 = arith.addf %2, %4 : vector<8x32xf32>
    %cst_5 = arith.constant 0.000000e+00 : f32
    %6 = vector.broadcast %cst_5 : f32 to vector<8x32xf32>
    %7 = arith.maximumf %5, %6 : vector<8x32xf32>
    %c0_6 = arith.constant 0 : index
    %c0_7 = arith.constant 0 : index
    %8 = vector.load %arg4[%c0_6, %c0_7] : memref<32x32xf32, #tpu.memory_space<vmem>>, vector<32x32xf32>
    %cst_8 = arith.constant dense<0.000000e+00> : vector<8x32xf32>
    %9 = tpu.matmul %7, %8, %cst_8 {dimension_numbers = #tpu.dot_dimension_numbers<[1], [0], [0], [1], [0, 0, 1, 1], [], []>} : vector<8x32xf32>, vector<32x32xf32>, vector<8x32xf32> -> vector<8x32xf32>
    %c0_9 = arith.constant 0 : index
    %c0_10 = arith.constant 0 : index
    %10 = vector.load %arg5[%c0_9, %c0_10] : memref<1x32xf32, #tpu.memory_space<vmem>>, vector<1x32xf32>
    %11 = vector.broadcast %10 : vector<1x32xf32> to vector<8x32xf32>
    %12 = arith.addf %9, %11 : vector<8x32xf32>
    %cst_11 = arith.constant 0.000000e+00 : f32
    %13 = vector.broadcast %cst_11 : f32 to vector<8x32xf32>
    %14 = arith.maximumf %12, %13 : vector<8x32xf32>
    %c0_12 = arith.constant 0 : index
    %c0_13 = arith.constant 0 : index
    %15 = vector.load %arg6[%c0_12, %c0_13] : memref<32x3xf32, #tpu.memory_space<vmem>>, vector<32x3xf32>
    %cst_14 = arith.constant dense<0.000000e+00> : vector<8x3xf32>
    %16 = tpu.matmul %14, %15, %cst_14 {dimension_numbers = #tpu.dot_dimension_numbers<[1], [0], [0], [1], [0, 0, 1, 1], [], []>} : vector<8x32xf32>, vector<32x3xf32>, vector<8x3xf32> -> vector<8x3xf32>
    %c0_15 = arith.constant 0 : index
    %c0_16 = arith.constant 0 : index
    %17 = vector.load %arg7[%c0_15, %c0_16] : memref<1x3xf32, #tpu.memory_space<vmem>>, vector<1x3xf32>
    %18 = vector.broadcast %17 : vector<1x3xf32> to vector<8x3xf32>
    %19 = arith.addf %16, %18 : vector<8x3xf32>
    %c0_17 = arith.constant 0 : index
    %c0_18 = arith.constant 0 : index
    %20 = vector.load %arg8[%c0_17, %c0_18] : memref<8x3xf32, #tpu.memory_space<vmem>>, vector<8x3xf32>
    tpu.vector_store %arg8[%c0_17, %c0_18], %19 {strides = array<i32>} : memref<8x3xf32, #tpu.memory_space<vmem>>, vector<8x3xf32>,
    return
  }
  func.func @transform_0(%arg0: i32) -> (i32, i32) {
    %c0_i32 = arith.constant 0 : i32
    %c0_i32_0 = arith.constant 0 : i32
    return %arg0, %c0_i32 : i32, i32
  }
  func.func @transform_1(%arg0: i32) -> (i32, i32) {
    %c0_i32 = arith.constant 0 : i32
    %c0_i32_0 = arith.constant 0 : i32
    %c0_i32_1 = arith.constant 0 : i32
    return %c0_i32, %c0_i32_0 : i32, i32
  }
  func.func @transform_2(%arg0: i32) -> (i32, i32) {
    %c0_i32 = arith.constant 0 : i32
    %c0_i32_0 = arith.constant 0 : i32
    %c0_i32_1 = arith.constant 0 : i32
    return %c0_i32, %c0_i32_0 : i32, i32
  }
  func.func @transform_3(%arg0: i32) -> (i32, i32) {
    %c0_i32 = arith.constant 0 : i32
    %c0_i32_0 = arith.constant 0 : i32
    %c0_i32_1 = arith.constant 0 : i32
    return %c0_i32, %c0_i32_0 : i32, i32
  }
  func.func @transform_4(%arg0: i32) -> (i32, i32) {
    %c0_i32 = arith.constant 0 : i32
    %c0_i32_0 = arith.constant 0 : i32
    %c0_i32_1 = arith.constant 0 : i32
    return %c0_i32, %c0_i32_0 : i32, i32
  }
  func.func @transform_5(%arg0: i32) -> (i32, i32) {
    %c0_i32 = arith.constant 0 : i32
    %c0_i32_0 = arith.constant 0 : i32
    %c0_i32_1 = arith.constant 0 : i32
    return %c0_i32, %c0_i32_0 : i32, i32
  }
  func.func @transform_6(%arg0: i32) -> (i32, i32) {
    %c0_i32 = arith.constant 0 : i32
    %c0_i32_0 = arith.constant 0 : i32
    %c0_i32_1 = arith.constant 0 : i32
    return %c0_i32, %c0_i32_0 : i32, i32
  }
  func.func @transform_7(%arg0: i32) -> (i32, i32) {
    %c0_i32 = arith.constant 0 : i32
    %c0_i32_0 = arith.constant 0 : i32
    return %arg0, %c0_i32 : i32, i32
  }
}

</mosaic_0001>

<bundles_post_ra>
// kernel: tpu_custom_call.1
= control target key start
LH: loop header
LB: loop body
LE: loop exit
PB: predicated region body
PF: predicated region fallthrough
CT: control target
= control target key end

     0   :  { %12 = vsyncpa [#allocation3], 0  ;;  %s511_s0 = inlined_call_operand.vmem [shape: f32[8,10], index: 0, kind: input, shape index: {}]   ;;  %s512_s1 = inlined_call_operand.hbm [shape: f32[10,32], index: 1, kind: input, shape index: {}]   ;;  %s513_s2 = inlined_call_operand.vmem [shape: f32[1,32], index: 2, kind: input, shape index: {}]   ;;  %s514_s3 = inlined_call_operand.vmem [shape: f32[32,32], index: 3, kind: input, shape index: {}]   ;;  %s515_s4 = inlined_call_operand.hbm [shape: f32[1,32], index: 4, kind: input, shape index: {}]   ;;  %s516_s5 = inlined_call_operand.vmem [shape: f32[32,3], index: 5, kind: input, shape index: {}]   ;;  %s517_s6 = inlined_call_operand.vmem [shape: f32[1,3], index: 6, kind: input, shape index: {}]   ;;  %s518_s7 = inlined_call_operand.vmem [shape: f32[8,3], index: 7, kind: output, shape index: {}]  }
   0x1   :  { %13 = vsyncpa [#allocation5], 0  ;;  %s418_s24 = smov [#allocation2]  }
   0x2   :  { %s21_s25 = sshll.u32 %s418_s24, 4  ;;  %s22_s25 = int_to_ptr.vmem [resolvable:$true] %s21_s25 }
   0x3   :  { %s382_s26 = scalar_lea.vmem %s22_s25, 256  ;;  %p387_p1 = scmp.lt.s32.totalorder %s22_s25, %s22_s25 }
   0x4   :  { %p383_p0 = scmp.ne.s32.totalorder %s22_s25, %s382_s26  ;;  %p388_p2 = scmp.lt.s32.totalorder %s382_s26, %s382_s26 }
   0x6   :  { %p389_p3 = por %p388_p2, %p387_p1 }
   0x8   :  { %p390_p4 = pnand %p389_p3, %p383_p0 }
   0xa   :  { %393 = shalt.err (!%p390_p4)
}
   0xb   :  { %s419_s27 = smov 128   ;;  %s420_s28 = smov 8  }
   0xc   :  { %27 = dma.hbm_to_vmem [thread:$0]  %s512_s1, 256, %s22_s25, [#allocation3], %s419_s27, %s419_s27, %s420_s28  }
   0xd   :  { %s421_s8 = smov [#allocation4]  }
   0xe   :  { %s38_s9 = sshll.u32 %s421_s8, 4  ;;  %s39_s9 = int_to_ptr.vmem [resolvable:$true] %s38_s9 }
   0xf   :  { %s402_s10 = scalar_lea.vmem %s39_s9, 16  ;;  %s406_s11 = scalar_lea.vmem %s39_s9, 32 }
  0x10   :  { %p403_p5 = scmp.ne.s32.totalorder %s39_s9, %s402_s10  ;;  %p407_p6 = scmp.lt.s32.totalorder %s39_s9, %s39_s9 }
  0x11   :  { %p408_p7 = scmp.lt.s32.totalorder %s406_s11, %s402_s10 }
  0x13   :  { %p409_p8 = por %p408_p7, %p407_p6 }
  0x15   :  { %p410_p9 = pnand %p409_p8, %p403_p5 }
  0x17   :  { %413 = shalt.err (!%p410_p9)
}
  0x18   :  { %41 = dma.hbm_to_vmem [thread:$0]  %s515_s4, 16, %s39_s9, [#allocation5]  }
  0x19   :  { %414 = dma.done.wait [#allocation3], 256  }
  0x1a   :  { %415 = vsyncadd [#allocation3], 4294967040 }
  0x1b   :  { %416 = dma.done.wait [#allocation5], 16  }
  0x1c   :  { %417 = vsyncadd [#allocation5], 4294967280  ;;  %v422_v0 = vmov 0.0   ;;  %vm423_vm0 = vmmov 0   ;;  %vm66_vm1 = vcmask 1041408   ;;  %v53_v2 = vld [vmem:[#allocation2] sm:$0xff] }
  0x1d   :  { %339 = vmatprep.subr.mxu0 %v422_v0  ;;  %343 = vmatprep.mubr.msk.f32.mxu0 %vm423_vm0, %v422_v0  ;;  %v54_v1 = vld [vmem:[#allocation2 + $0x8] sm:$0x3]  ;;  %v52_v3 = vld [vmem:[%s511_s0] sm:$0xff]  ;;  %vm62_vm2 = vcmask 80896   ;;  %v144_v4 = vld [vmem:[%s514_s3 + $0x18] sm:$0xff]  ;;  %vm152_vm3 = vcmask 261120  }
  0x1e   :  { %346 = vmatprep.subr.mxu1 %v422_v0  ;;  %354 = vmatprep.mubr.msk.f32.mxu1 %vm423_vm0, %v422_v0  ;;  %v143_v5 = vld [vmem:[%s514_s3 + $0x10] sm:$0xff]  ;;  %v142_v6 = vld [vmem:[%s514_s3 + $0x8] sm:$0xff]  ;;  %v141_v7 = vld [vmem:[%s514_s3] sm:$0xff]  ;;  %vm311_vm4 = vcmask 23552  }
  0x1f   :  { %340 = vmatpush3.msk.msra.mxu0 %vm66_vm1, %v54_v1  ;;  %347 = vmatpush3.msra.mxu1 %v144_v4  ;;  %v230_v8 = vld [vmem:[%s516_s5 + $0x18] sm:$0xff]  ;;  %v319_v9 = vld [vmem:[%s513_s2] ss:$0 sm:$0xff]  ;;  %v229_v14 = vld [vmem:[%s516_s5 + $0x10] sm:$0xff] }
  0x20   :  { %341 = vmatprep.subr.mxu0 %v422_v0  ;;  %348 = vmatprep.subr.mxu1 %v422_v0  ;;  %v228_v15 = vld [vmem:[%s516_s5 + $0x8] sm:$0xff]  ;;  %v227_v16 = vld [vmem:[%s516_s5] sm:$0xff]  ;;  %v322_v17 = vld [vmem:[#allocation4] ss:$0 sm:$0xff] }
  0x21   :  { %342 = vmatpush3.msra.mxu0 %v53_v2  ;;  %349 = vmatpush3.msra.mxu1 %v143_v5  ;;  %v324_v22 = vld [vmem:[%s517_s6] ss:$0 sm:$0xff] }
  0x22   :  { %344 = vmatmul.mubr.msk.f32.vlgmr.msra.gmra.mxu0 %vm62_vm2, %v52_v3  ;;  %357 = vmatprep.subr.mxu0 %v422_v0 }
  0x23   :  { %365 = vmatprep.mubr.msk.f32.mxu0 %vm423_vm0, %v422_v0  ;;  %350 = vmatprep.subr.mxu1 %v422_v0 }
  0x24   :  { %351 = vmatpush3.msra.mxu1 %v142_v6  ;;  %358 = vmatpush3.msra.mxu0 %v230_v8 }
  0x25   :  { %352 = vmatprep.subr.mxu1 %v422_v0  ;;  %359 = vmatprep.subr.mxu0 %v422_v0 }
  0x26   :  { %353 = vmatpush3.msra.mxu1 %v141_v7  ;;  %360 = vmatpush3.msra.mxu0 %v229_v14 }
  0x27   :  { %361 = vmatprep.subr.mxu0 %v422_v0 }
  0x28   :  { %362 = vmatpush3.msra.mxu0 %v228_v15 }
  0x29   :  { %363 = vmatprep.subr.mxu0 %v422_v0 }
  0x2a   :  { %364 = vmatpush3.msra.mxu0 %v227_v16 }
  0xe2   :  { %v136_v10 = vpop.f32.mrf.mxu0 }
  0xe3   :  { %v137_v11 = vadd.f32 %v319_v9, %v136_v10 }
  0xe4   :  { %v345_v12 = vpop.f32.mrf.mxu0 }
  0xe5   :  { %v140_v13 = vmax.f32 %v137_v11, 0.0 }
  0xe7   :  { %355 = vmatmul.mubr.msk.f32.vlgmr.msra.gmra.mxu1 %vm152_vm3, %v140_v13 }
 0x1a7   :  { %v222_v18 = vpop.f32.mrf.mxu1 }
 0x1a8   :  { %v223_v19 = vadd.f32 %v322_v17, %v222_v18 }
 0x1a9   :  { %v356_v20 = vpop.f32.mrf.mxu1 }
 0x1aa   :  { %v226_v21 = vmax.f32 %v223_v19, 0.0 }
 0x1ac   :  { %366 = vmatmul.mubr.msk.f32.vlgmr.msra.gmra.mxu0 %vm152_vm3, %v226_v21 }
 0x26c   :  { %v307_v23 = vpop.f32.mrf.mxu0 }
 0x26d   :  { %v308_v24 = vadd.f32 %v324_v22, %v307_v23 }
 0x26e   :  { %v367_v25 = vpop.f32.mrf.mxu0 }
 0x26f   :  { %312 = vst.msk [vmem:[%s518_s7] sm:$0xff] %vm311_vm4, %v308_v24 }
 0x270   :  { %317 = vsyncpa [#allocation3], 1 }
 0x271   :  { %318 = vsyncpa [#allocation5], 1 }

</bundles_post_ra>
